<compile_context>
chip_gen: v7x
topology: tpu7x:2x2x1
jax: 0.10.0
libtpu: 0.0.40
codegen_flags: <defaults>
</compile_context>

<pallas_src>
import jax
import jax.numpy as jnp
from jax.experimental import pallas as pl
from jax.experimental.pallas import tpu as pltpu

LANE = 128


# ----------------------------------------------------------------------------
# Deterministic parameter construction (shapes from Discriminator.__init__).
# Unused in forward (forward is identity); provided only for fidelity and NOT
# called in the hot path / __main__ to avoid pointless device allocation.
# ----------------------------------------------------------------------------
def make_params():
    def det(shape, scale, offset):
        n = 1
        for s in shape:
            n *= s
        v = (jnp.arange(n, dtype=jnp.float32) % 97) / 97.0
        return (scale * (v - 0.5) + offset).reshape(shape)

    # TODO(synk): conv/bnorm/lrelu layers are defined but never called in the
    # reference forward(); they are intentionally not applied here.
    return {
        "conv1_w": det((128, 3, 4, 4), 0.02, 0.0),
        "conv1_b": det((128,), 0.0, 0.0),
        "conv2_w": det((256, 128, 4, 4), 0.02, 0.0),
        "conv2_b": det((256,), 0.0, 0.0),
        "conv3_w": det((512, 256, 4, 4), 0.02, 0.0),
        "conv3_b": det((512,), 0.0, 0.0),
        "conv4_w": det((1024, 512, 4, 4), 0.02, 0.0),
        "conv4_b": det((1024,), 0.0, 0.0),
        "conv5_w": det((1, 1024, 4, 4), 0.02, 0.0),
        "conv5_b": det((1,), 0.0, 0.0),
        # bnorm1 is re-assigned 3x in __init__; the surviving one is BN(1024)
        "bnorm1_gamma": jnp.ones((1024,), jnp.float32),
        "bnorm1_beta": jnp.zeros((1024,), jnp.float32),
    }


# ----------------------------------------------------------------------------
# Pallas kernel: identity copy (the entire forward pass of the module).
# ----------------------------------------------------------------------------
def _copy_kernel(x_ref, o_ref):
    o_ref[...] = x_ref[...]


def _choose_2d_view(total):
    """Widest lane-dense (multiple-of-128) 2D view that divides `total`."""
    for width in (2048, 1024, 512, 256, 128):
        if total % width == 0:
            return total // width, width
    return None


def discriminator_forward(x, params=None):
    """Reproduces Discriminator.forward(x) -> x (identity), via Pallas."""
    del params  # unused, matching the PyTorch forward
    orig_shape = x.shape
    dtype = x.dtype
    total = x.size

    view = _choose_2d_view(total)
    if view is None:
        # Rare fallback: element count not a multiple of 128.
        pad = (-total) % LANE
        flat = jnp.pad(x.reshape(-1), (0, pad))
        rows, width = flat.size // LANE, LANE
        x2d = flat.reshape(rows, width)
    else:
        pad = 0
        rows, width = view
        x2d = x.reshape(rows, width)

    # Row tile: full extent when small (always legal), otherwise 1024 rows
    # (multiple of 8) -> <= 1 MiB f32 per buffer at width=128, well under the
    # scoped VMEM limit of every generation even with double buffering.
    tile_r = rows if rows <= 1024 else 1024
    grid = (pl.cdiv(rows, tile_r),)

    out2d = pl.pallas_call(
        _copy_kernel,
        out_shape=jax.ShapeDtypeStruct((rows, width), dtype),
        grid_spec=pltpu.PrefetchScalarGridSpec(
            num_scalar_prefetch=0,
            grid=grid,
            in_specs=[pl.BlockSpec((tile_r, width), lambda i: (i, 0))],
            out_specs=pl.BlockSpec((tile_r, width), lambda i: (i, 0)),
        ),
        compiler_params=pltpu.CompilerParams(
            dimension_semantics=("parallel",),
        ),
        # Output buffer aliases the input buffer: inside a jit this removes
        # the HBM->HBM round trip entirely (the forward really is identity).
        input_output_aliases={0: 0},
    )(x2d)

    if pad:
        out = out2d.reshape(-1)[:total].reshape(orig_shape)
    else:
        out = out2d.reshape(orig_shape)
    return out


if __name__ == "__main__":
    key = jax.random.PRNGKey(0)
    # small NCHW input consistent with the 3-channel image discriminator
    x = jax.random.normal(key, (2, 3, 16, 16), dtype=jnp.float32)

    fwd = jax.jit(discriminator_forward)
    y = fwd(x)
    y = jax.block_until_ready(y)

    # forward is identity: verify exact pass-through
    assert y.shape == x.shape and y.dtype == x.dtype
    assert bool(jnp.all(y == x))
    print("KERNEL_OK")
</pallas_src>

<mosaic_0001>
module attributes {stable_mosaic.version = 11 : i64} {
  func.func @_copy_kernel(%arg0: i32, %arg1: memref<3x512xf32, #tpu.memory_space<vmem>>, %arg2: memref<3x512xf32, #tpu.memory_space<vmem>>) attributes {dimension_semantics = [#tpu.dimension_semantics<parallel>], iteration_bounds = array<i64: 1>, scalar_prefetch = 0 : i64, scratch_operands = 0 : i64, tpu.core_type = #tpu.core_type<tc>, window_params = [{transform_indices = @transform_0, window_bounds = array<i64: 3, 512>}, {transform_indices = @transform_1, window_bounds = array<i64: 3, 512>}]} {
    %c0 = arith.constant 0 : index
    %c0_0 = arith.constant 0 : index
    %0 = vector.load %arg1[%c0, %c0_0] : memref<3x512xf32, #tpu.memory_space<vmem>>, vector<3x512xf32>
    %c0_1 = arith.constant 0 : index
    %c0_2 = arith.constant 0 : index
    %1 = vector.load %arg2[%c0_1, %c0_2] : memref<3x512xf32, #tpu.memory_space<vmem>>, vector<3x512xf32>
    tpu.vector_store %arg2[%c0_1, %c0_2], %0 {strides = array<i32>} : memref<3x512xf32, #tpu.memory_space<vmem>>, vector<3x512xf32>,
    return
  }
  func.func @transform_0(%arg0: i32) -> (i32, i32) {
    %c0_i32 = arith.constant 0 : i32
    %c0_i32_0 = arith.constant 0 : i32
    return %arg0, %c0_i32 : i32, i32
  }
  func.func @transform_1(%arg0: i32) -> (i32, i32) {
    %c0_i32 = arith.constant 0 : i32
    %c0_i32_0 = arith.constant 0 : i32
    return %arg0, %c0_i32 : i32, i32
  }
}

</mosaic_0001>

<bundles_post_ra>
// kernel: discriminator_forward.1
= control target key start
LH: loop header
LB: loop body
LE: loop exit
PB: predicated region body
PF: predicated region fallthrough
CT: control target
= control target key end

     0   :  { %s38_s0 = inlined_call_operand.vmem [shape: f32[3,512], index: 0, kind: input, shape index: {}, may-alias: {0,1}]   ;;  %s39_s1 = inlined_call_operand.vmem [shape: f32[3,512], index: 1, kind: output, shape index: {}, may-alias: {0,1}]  }
   0x1   :  { %v8_v0 = vld [vmem:[%s38_s0] sm:$0x77]  ;;  %v9_v1 = vld [vmem:[%s38_s0 + $0x8] sm:$0x77] }
   0x2   :  { %10 = vst [vmem:[%s39_s1] sm:$0x77] %v8_v0  ;;  %11 = vst [vmem:[%s39_s1 + $0x8] sm:$0x77] %v9_v1 }

</bundles_post_ra>
